<compile_context>
chip_gen: v6e
topology: v6e:2x2x1
jax: 0.10.0
libtpu: 0.0.40
codegen_flags: <defaults>
</compile_context>

<pallas_src>
import jax
import jax.numpy as jnp
import numpy as np
from jax.experimental import pallas as pl
from jax.experimental.pallas import tpu as pltpu


def _round_up(n, m):
    return ((n + m - 1) // m) * m


def _add_fusion_kernel(x_ref, g_ref, w1_ref, b1_ref, w2_ref, b2_ref, out_ref):
    """out = relu((x + g) @ W1^T + b1) @ W2^T + b2 for one row tile."""
    # Elementwise fusion of the two inputs (VPU).
    z = x_ref[...] + g_ref[...]
    # First Linear + ReLU: MXU matmul with f32 accumulation, f32 bias.
    h = jnp.dot(z.astype(w1_ref.dtype), w1_ref[...],
                preferred_element_type=jnp.float32)
    h = jnp.maximum(h + b1_ref[...], 0.0)
    # Second Linear: cast activation to the weight dtype (bf16 path), f32 acc.
    out = jnp.dot(h.astype(w2_ref.dtype), w2_ref[...],
                  preferred_element_type=jnp.float32)
    out_ref[...] = (out + b2_ref[...]).astype(out_ref.dtype)


def add_fusion_forward(x, g, params, *, block_rows=2048, io_dtype=None):
    """x, g: (..., E).  params: w1_T/w2_T (E, E) = nn.Linear weight^T, b1/b2 (1, E).

    io_dtype=None       -> f32 I/O (matches reference to ~1e-5).
    io_dtype=jnp.bfloat16 -> bf16 I/O (half the HBM traffic; f32 accumulation).
    """
    orig_shape = x.shape
    E = orig_shape[-1]
    xm = x.reshape(-1, E)
    gm = g.reshape(-1, E)
    M = xm.shape[0]

    w1 = params["w1_T"]
    w2 = params["w2_T"]
    b1 = params["b1"].astype(jnp.float32).reshape(1, E)
    b2 = params["b2"].astype(jnp.float32).reshape(1, E)
    if io_dtype is not None:
        xm, gm = xm.astype(io_dtype), gm.astype(io_dtype)
        w1, w2 = w1.astype(io_dtype), w2.astype(io_dtype)
    out_dtype = xm.dtype

    # Sublane packing: 8 rows per vreg for 32-bit I/O, 16 for bf16.
    row_mult = 16 if jnp.dtype(out_dtype).itemsize == 2 else 8
    # Fixed, bounded row tile; the cdiv grid handles any M (trailing partial
    # block is padded/masked by Pallas).  No `tb = M` fallback.
    tb = max(row_mult,
             min(_round_up(block_rows, row_mult), _round_up(M, row_mult)))
    grid = (pl.cdiv(M, tb),)

    def rows_map(i):
        return (i, 0)

    def resident(shape):
        # Constant index_map -> operand is VMEM-resident across all grid
        # steps; single-buffer it (no need for a second DMA buffer).
        return pl.BlockSpec(shape, lambda i: (0,) * len(shape),
                            pipeline_mode=pl.Buffered(1))

    out = pl.pallas_call(
        _add_fusion_kernel,
        out_shape=jax.ShapeDtypeStruct((M, E), out_dtype),
        grid_spec=pltpu.PrefetchScalarGridSpec(
            num_scalar_prefetch=0,
            grid=grid,
            in_specs=[
                pl.BlockSpec((tb, E), rows_map),   # x rows (streamed)
                pl.BlockSpec((tb, E), rows_map),   # g rows (streamed)
                resident((E, E)),                  # W1^T  (resident)
                resident((1, E)),                  # b1    (f32, resident)
                resident((E, E)),                  # W2^T  (resident)
                resident((1, E)),                  # b2    (f32, resident)
            ],
            out_specs=pl.BlockSpec((tb, E), rows_map),
        ),
        compiler_params=pltpu.CompilerParams(
            # Row axis is embarrassingly parallel -> megacore sharding (v7x).
            dimension_semantics=("parallel",),
            # Covers tb=2048 f32 streams on v5e's smaller default scoped VMEM
            # limit; well under v7x's 64 MiB physical VMEM.
            vmem_limit_bytes=32 * 1024 * 1024,
        ),
    )(xm, gm, w1, b1, w2, b2)
    return out.reshape(orig_shape)


def add_fusion_reference(x, g, params):
    """Pure-JAX f32 reference matching the PyTorch AddFusionModel forward."""
    E = x.shape[-1]
    z = (x + g).astype(jnp.float32).reshape(-1, E)
    h = jnp.maximum(
        jnp.dot(z, params["w1_T"], preferred_element_type=jnp.float32,
                precision=jax.lax.Precision.HIGHEST) + params["b1"], 0.0)
    out = jnp.dot(h, params["w2_T"], preferred_element_type=jnp.float32,
                  precision=jax.lax.Precision.HIGHEST) + params["b2"]
    return out.reshape(x.shape)


if __name__ == "__main__":
    # Small, TPU-layout-friendly demo: embedding_dim E = 128 (full lane span),
    # a (5, 11) leading batch so the flattened row count M = 55 exercises the
    # cdiv grid + padded trailing block.
    E = 128

    key = jax.random.PRNGKey(0)
    keys = jax.random.split(key, 6)
    scale = 1.0 / np.sqrt(E)

    def u(k, shape):
        return jax.random.uniform(k, shape, jnp.float32, -scale, scale)

    # nn.Linear weights are (out, in); store transposed so kernel does x @ W^T.
    params = {
        "w1_T": u(keys[0], (E, E)).T,
        "b1":   u(keys[1], (E,)).reshape(1, E),
        "w2_T": u(keys[2], (E, E)).T,
        "b2":   u(keys[3], (E,)).reshape(1, E),
    }

    x = jax.random.normal(keys[4], (5, 11, E), jnp.float32)
    g = jax.random.normal(keys[5], (5, 11, E), jnp.float32)

    ref = np.asarray(add_fusion_reference(x, g, params))

    # 1) f32 path, default (large) row tile.
    out = jax.block_until_ready(add_fusion_forward(x, g, params))
    np.testing.assert_allclose(np.asarray(out), ref, rtol=1e-4, atol=1e-4)

    # 2) f32 path, tiny tile -> multi-step "parallel" grid + partial last block.
    out_tiled = jax.block_until_ready(
        add_fusion_forward(x, g, params, block_rows=16))
    np.testing.assert_allclose(np.asarray(out_tiled), ref, rtol=1e-4, atol=1e-4)

    # 3) bf16 I/O path (memory-bound win); f32 accumulation in-kernel, so only
    #    the I/O rounding shows up -> relaxed tolerance.
    out_bf16 = jax.block_until_ready(
        add_fusion_forward(x, g, params, io_dtype=jnp.bfloat16))
    np.testing.assert_allclose(np.asarray(out_bf16).astype(np.float32), ref,
                               rtol=5e-2, atol=5e-2)

    print("KERNEL_OK")
</pallas_src>

<mosaic_0001>
module attributes {stable_mosaic.version = 11 : i64} {
  func.func @_add_fusion_kernel(%arg0: i32, %arg1: memref<56x128xf32, #tpu.memory_space<vmem>>, %arg2: memref<56x128xf32, #tpu.memory_space<vmem>>, %arg3: memref<128x128xf32, #tpu.memory_space<vmem>>, %arg4: memref<1x128xf32, #tpu.memory_space<vmem>>, %arg5: memref<128x128xf32, #tpu.memory_space<vmem>>, %arg6: memref<1x128xf32, #tpu.memory_space<vmem>>, %arg7: memref<56x128xf32, #tpu.memory_space<vmem>>) attributes {dimension_semantics = [#tpu.dimension_semantics<parallel>], iteration_bounds = array<i64: 1>, scalar_prefetch = 0 : i64, scratch_operands = 0 : i64, tpu.core_type = #tpu.core_type<tc>, window_params = [{transform_indices = @transform_0, window_bounds = array<i64: 56, 128>}, {transform_indices = @transform_1, window_bounds = array<i64: 56, 128>}, {pipeline_mode = #tpu.pipeline_mode<synchronous>, transform_indices = @transform_2, window_bounds = array<i64: 128, 128>}, {pipeline_mode = #tpu.pipeline_mode<synchronous>, transform_indices = @transform_3, window_bounds = array<i64: 1, 128>}, {pipeline_mode = #tpu.pipeline_mode<synchronous>, transform_indices = @transform_4, window_bounds = array<i64: 128, 128>}, {pipeline_mode = #tpu.pipeline_mode<synchronous>, transform_indices = @transform_5, window_bounds = array<i64: 1, 128>}, {transform_indices = @transform_6, window_bounds = array<i64: 56, 128>}]} {
    %c0 = arith.constant 0 : index
    %c0_0 = arith.constant 0 : index
    %0 = vector.load %arg1[%c0, %c0_0] : memref<56x128xf32, #tpu.memory_space<vmem>>, vector<56x128xf32>
    %c0_1 = arith.constant 0 : index
    %c0_2 = arith.constant 0 : index
    %1 = vector.load %arg2[%c0_1, %c0_2] : memref<56x128xf32, #tpu.memory_space<vmem>>, vector<56x128xf32>
    %2 = arith.addf %0, %1 : vector<56x128xf32>
    %c0_3 = arith.constant 0 : index
    %c0_4 = arith.constant 0 : index
    %3 = vector.load %arg3[%c0_3, %c0_4] : memref<128x128xf32, #tpu.memory_space<vmem>>, vector<128x128xf32>
    %cst = arith.constant dense<0.000000e+00> : vector<56x128xf32>
    %4 = tpu.matmul %2, %3, %cst {dimension_numbers = #tpu.dot_dimension_numbers<[1], [0], [0], [1], [0, 0, 1, 1], [], []>} : vector<56x128xf32>, vector<128x128xf32>, vector<56x128xf32> -> vector<56x128xf32>
    %c0_5 = arith.constant 0 : index
    %c0_6 = arith.constant 0 : index
    %5 = vector.load %arg4[%c0_5, %c0_6] : memref<1x128xf32, #tpu.memory_space<vmem>>, vector<1x128xf32>
    %6 = vector.broadcast %5 : vector<1x128xf32> to vector<56x128xf32>
    %7 = arith.addf %4, %6 : vector<56x128xf32>
    %cst_7 = arith.constant 0.000000e+00 : f32
    %8 = vector.broadcast %cst_7 : f32 to vector<56x128xf32>
    %9 = arith.maximumf %7, %8 : vector<56x128xf32>
    %c0_8 = arith.constant 0 : index
    %c0_9 = arith.constant 0 : index
    %10 = vector.load %arg5[%c0_8, %c0_9] : memref<128x128xf32, #tpu.memory_space<vmem>>, vector<128x128xf32>
    %cst_10 = arith.constant dense<0.000000e+00> : vector<56x128xf32>
    %11 = tpu.matmul %9, %10, %cst_10 {dimension_numbers = #tpu.dot_dimension_numbers<[1], [0], [0], [1], [0, 0, 1, 1], [], []>} : vector<56x128xf32>, vector<128x128xf32>, vector<56x128xf32> -> vector<56x128xf32>
    %c0_11 = arith.constant 0 : index
    %c0_12 = arith.constant 0 : index
    %12 = vector.load %arg6[%c0_11, %c0_12] : memref<1x128xf32, #tpu.memory_space<vmem>>, vector<1x128xf32>
    %13 = vector.broadcast %12 : vector<1x128xf32> to vector<56x128xf32>
    %14 = arith.addf %11, %13 : vector<56x128xf32>
    %c0_13 = arith.constant 0 : index
    %c0_14 = arith.constant 0 : index
    %15 = vector.load %arg7[%c0_13, %c0_14] : memref<56x128xf32, #tpu.memory_space<vmem>>, vector<56x128xf32>
    tpu.vector_store %arg7[%c0_13, %c0_14], %14 {strides = array<i32>} : memref<56x128xf32, #tpu.memory_space<vmem>>, vector<56x128xf32>,
    return
  }
  func.func @transform_0(%arg0: i32) -> (i32, i32) {
    %c0_i32 = arith.constant 0 : i32
    %c0_i32_0 = arith.constant 0 : i32
    return %arg0, %c0_i32 : i32, i32
  }
  func.func @transform_1(%arg0: i32) -> (i32, i32) {
    %c0_i32 = arith.constant 0 : i32
    %c0_i32_0 = arith.constant 0 : i32
    return %arg0, %c0_i32 : i32, i32
  }
  func.func @transform_2(%arg0: i32) -> (i32, i32) {
    %c0_i32 = arith.constant 0 : i32
    %c0_i32_0 = arith.constant 0 : i32
    %c0_i32_1 = arith.constant 0 : i32
    return %c0_i32, %c0_i32_0 : i32, i32
  }
  func.func @transform_3(%arg0: i32) -> (i32, i32) {
    %c0_i32 = arith.constant 0 : i32
    %c0_i32_0 = arith.constant 0 : i32
    %c0_i32_1 = arith.constant 0 : i32
    return %c0_i32, %c0_i32_0 : i32, i32
  }
  func.func @transform_4(%arg0: i32) -> (i32, i32) {
    %c0_i32 = arith.constant 0 : i32
    %c0_i32_0 = arith.constant 0 : i32
    %c0_i32_1 = arith.constant 0 : i32
    return %c0_i32, %c0_i32_0 : i32, i32
  }
  func.func @transform_5(%arg0: i32) -> (i32, i32) {
    %c0_i32 = arith.constant 0 : i32
    %c0_i32_0 = arith.constant 0 : i32
    %c0_i32_1 = arith.constant 0 : i32
    return %c0_i32, %c0_i32_0 : i32, i32
  }
  func.func @transform_6(%arg0: i32) -> (i32, i32) {
    %c0_i32 = arith.constant 0 : i32
    %c0_i32_0 = arith.constant 0 : i32
    return %arg0, %c0_i32 : i32, i32
  }
}

</mosaic_0001>

<bundles_post_ra>
// kernel: tpu_custom_call.1
= control target key start
LH: loop header
LB: loop body
LE: loop exit
PB: predicated region body
PF: predicated region fallthrough
CT: control target
= control target key end

     0   :  { %11 = vsyncpa [#allocation3], 0  ;;  %s790_s0 = inlined_call_operand.hbm [shape: f32[55,128], index: 0, kind: input, shape index: {}]   ;;  %s791_s1 = inlined_call_operand.hbm [shape: f32[55,128], index: 1, kind: input, shape index: {}]   ;;  %s792_s2 = inlined_call_operand.hbm [shape: f32[128,128], index: 2, kind: input, shape index: {}]   ;;  %s793_s3 = inlined_call_operand.vmem [shape: f32[1,128], index: 3, kind: input, shape index: {}]   ;;  %s794_s4 = inlined_call_operand.hbm [shape: f32[128,128], index: 4, kind: input, shape index: {}]   ;;  %s795_s5 = inlined_call_operand.vmem [shape: f32[1,128], index: 5, kind: input, shape index: {}]   ;;  %s796_s6 = inlined_call_operand.hbm [shape: f32[55,128], index: 6, kind: output, shape index: {}]  }
   0x1   :  { %12 = vsyncpa [#allocation6], 0 }
   0x2   :  { %13 = vsyncpa [#allocation9], 0 }
   0x3   :  { %14 = vsyncpa [#allocation4], 0  ;;  %s650_s21 = smov [#allocation5]   ;;  %s651_s23 = smov [#allocation2]  }
   0x4   :  { %s32_s22 = sshll.u32 %s650_s21, 4  ;;  %s20_s24 = sshll.u32 %s651_s23, 4  ;;  %s33_s22 = int_to_ptr.vmem [resolvable:$true] %s32_s22  ;;  %s21_s24 = int_to_ptr.vmem [resolvable:$true] %s20_s24 }
   0x5   :  { %s550_s25 = scalar_lea.vmem %s33_s22, 896  ;;  %p555_p1 = scmp.lt.s32.totalorder %s33_s22, %s33_s22 }
   0x6   :  { %p551_p0 = scmp.ne.s32.totalorder %s33_s22, %s550_s25  ;;  %p556_p2 = scmp.lt.s32.totalorder %s550_s25, %s550_s25 }
   0x8   :  { %p557_p3 = por %p556_p2, %p555_p1 }
   0xa   :  { %p558_p4 = pnand %p557_p3, %p551_p0 }
   0xc   :  { %561 = shalt.err (!%p558_p4)
}
   0xd   :  { %s652_s26 = smov 128   ;;  %s653_s27 = smov 8  }
   0xe   :  { %38 = dma.hbm_to_vmem [thread:$0]  %s791_s1, 896, %s33_s22, [#allocation6], %s652_s26, %s652_s26, %s653_s27  }
   0xf   :  { %s570_s30 = scalar_lea.vmem %s21_s24, 896  ;;  %p575_p6 = scmp.lt.s32.totalorder %s21_s24, %s21_s24 }
  0x10   :  { %p571_p5 = scmp.ne.s32.totalorder %s21_s24, %s570_s30  ;;  %p576_p7 = scmp.lt.s32.totalorder %s570_s30, %s570_s30 }
  0x12   :  { %p577_p8 = por %p576_p7, %p575_p6 }
  0x14   :  { %p578_p9 = pnand %p577_p8, %p571_p5 }
  0x16   :  { %581 = shalt.err (!%p578_p9)
}
  0x17   :  { %26 = dma.hbm_to_vmem [thread:$0]  %s790_s0, 896, %s21_s24, [#allocation3], %s652_s26, %s652_s26, %s653_s27  }
  0x18   :  { %s654_s9 = smov [#allocation7]   ;;  %s655_s11 = smov [#allocation8]  }
  0x19   :  { %s44_s10 = sshll.u32 %s654_s9, 4  ;;  %s58_s12 = sshll.u32 %s655_s11, 4  ;;  %s45_s10 = int_to_ptr.vmem [resolvable:$true] %s44_s10  ;;  %s59_s12 = int_to_ptr.vmem [resolvable:$true] %s58_s12 }
  0x1a   :  { %s590_s1 = scalar_lea.vmem %s45_s10, 2048  ;;  %p595_p11 = scmp.lt.s32.totalorder %s45_s10, %s45_s10 }
  0x1b   :  { %p591_p10 = scmp.ne.s32.totalorder %s45_s10, %s590_s1  ;;  %p596_p12 = scmp.lt.s32.totalorder %s590_s1, %s590_s1 }
  0x1d   :  { %p597_p13 = por %p596_p12, %p595_p11 }
  0x1f   :  { %p598_p0 = pnand %p597_p13, %p591_p10 }
  0x21   :  { %601 = shalt.err (!%p598_p0)
}
  0x22   :  { %50 = dma.hbm_to_vmem [thread:$0]  %s792_s2, 2048, %s45_s10, [#allocation6], %s652_s26, %s652_s26, %s653_s27  }
  0x23   :  { %s610_s0 = scalar_lea.vmem %s59_s12, 2048  ;;  %p615_p2 = scmp.lt.s32.totalorder %s59_s12, %s59_s12 }
  0x24   :  { %p611_p1 = scmp.ne.s32.totalorder %s59_s12, %s610_s0  ;;  %p616_p3 = scmp.lt.s32.totalorder %s610_s0, %s610_s0 }
  0x26   :  { %p617_p4 = por %p616_p3, %p615_p2 }
  0x28   :  { %p618_p5 = pnand %p617_p4, %p611_p1 }
  0x2a   :  { %621 = shalt.err (!%p618_p5)
}
  0x2b   :  { %64 = dma.hbm_to_vmem [thread:$0]  %s794_s4, 2048, %s59_s12, [#allocation9], %s652_s26, %s652_s26, %s653_s27  }
  0x2c   :  { %642 = dma.done.wait [#allocation3], 896  }
  0x2d   :  { %643 = vsyncadd [#allocation3], 4294966400 }
  0x2e   :  { %644 = dma.done.wait [#allocation6], 2944  }
  0x2f   :  { %645 = vsyncadd [#allocation6], 4294964352 }
  0x30   :  { %646 = dma.done.wait [#allocation9], 2048  }
  0x31   :  { %647 = vsyncadd [#allocation9], 4294965248  ;;  %v656_v0 = vmov 0.0   ;;  %vm657_vm0 = vmmov 0   ;;  %v115_v1 = vld [vmem:[#allocation7 + $0x78] sm:$0xff]  ;;  %v114_v2 = vld [vmem:[#allocation7 + $0x70] sm:$0xff] }
  0x32   :  { %427 = vmatprep.subr.mxu0 %v656_v0  ;;  %459 = vmatprep.mubr.msk.f32.mxu0 %vm657_vm0, %v656_v0  ;;  %v113_v3 = vld [vmem:[#allocation7 + $0x68] sm:$0xff]  ;;  %v112_v4 = vld [vmem:[#allocation7 + $0x60] sm:$0xff]  ;;  %v111_v5 = vld [vmem:[#allocation7 + $0x58] sm:$0xff] }
  0x33   :  { %480 = vmatprep.subr.mxu1 %v656_v0  ;;  %512 = vmatprep.mubr.msk.f32.mxu1 %vm657_vm0, %v656_v0  ;;  %v110_v6 = vld [vmem:[#allocation7 + $0x50] sm:$0xff]  ;;  %v109_v7 = vld [vmem:[#allocation7 + $0x48] sm:$0xff]  ;;  %v245_v8 = vld [vmem:[#allocation8 + $0x78] sm:$0xff] }
  0x34   :  { %428 = vmatpush3.msra.mxu0 %v115_v1  ;;  %v244_v9 = vld [vmem:[#allocation8 + $0x70] sm:$0xff]  ;;  %481 = vmatpush3.msra.mxu1 %v245_v8  ;;  %v108_v10 = vld [vmem:[#allocation7 + $0x40] sm:$0xff]  ;;  %v243_v11 = vld [vmem:[#allocation8 + $0x68] sm:$0xff] }
  0x35   :  { %429 = vmatprep.subr.mxu0 %v656_v0  ;;  %482 = vmatprep.subr.mxu1 %v656_v0  ;;  %v107_v12 = vld [vmem:[#allocation7 + $0x38] sm:$0xff]  ;;  %v242_v13 = vld [vmem:[#allocation8 + $0x60] sm:$0xff]  ;;  %v106_v14 = vld [vmem:[#allocation7 + $0x30] sm:$0xff] }
  0x36   :  { %430 = vmatpush3.msra.mxu0 %v114_v2  ;;  %483 = vmatpush3.msra.mxu1 %v244_v9  ;;  %v241_v15 = vld [vmem:[#allocation8 + $0x58] sm:$0xff]  ;;  %v105_v16 = vld [vmem:[#allocation7 + $0x28] sm:$0xff]  ;;  %v240_v17 = vld [vmem:[#allocation8 + $0x50] sm:$0xff] }
  0x37   :  { %431 = vmatprep.subr.mxu0 %v656_v0  ;;  %484 = vmatprep.subr.mxu1 %v656_v0  ;;  %v104_v18 = vld [vmem:[#allocation7 + $0x20] sm:$0xff]  ;;  %v239_v19 = vld [vmem:[#allocation8 + $0x48] sm:$0xff]  ;;  %v103_v20 = vld [vmem:[#allocation7 + $0x18] sm:$0xff] }
  0x38   :  { %432 = vmatpush3.msra.mxu0 %v113_v3  ;;  %485 = vmatpush3.msra.mxu1 %v243_v11  ;;  %v238_v21 = vld [vmem:[#allocation8 + $0x40] sm:$0xff]  ;;  %v102_v22 = vld [vmem:[#allocation7 + $0x10] sm:$0xff]  ;;  %v237_v23 = vld [vmem:[#allocation8 + $0x38] sm:$0xff] }
  0x39   :  { %433 = vmatprep.subr.mxu0 %v656_v0  ;;  %486 = vmatprep.subr.mxu1 %v656_v0  ;;  %v79_v24 = vld [vmem:[#allocation2] sm:$0xff]  ;;  %v86_v25 = vld [vmem:[#allocation5] sm:$0xff]  ;;  %v100_v28 = vld [vmem:[#allocation7] sm:$0xff] }
  0x3a   :  { %434 = vmatpush3.msra.mxu0 %v112_v4  ;;  %487 = vmatpush3.msra.mxu1 %v242_v13  ;;  %v101_v26 = vld [vmem:[#allocation7 + $0x8] sm:$0xff]  ;;  %v236_v27 = vld [vmem:[#allocation8 + $0x30] sm:$0xff]  ;;  %v93_v29 = vadd.f32 %v86_v25, %v79_v24  ;;  %v80_v31 = vld [vmem:[#allocation2 + $0x8] sm:$0xff] }
  0x3b   :  { %435 = vmatprep.subr.mxu0 %v656_v0  ;;  %488 = vmatprep.subr.mxu1 %v656_v0  ;;  %v235_v30 = vld [vmem:[#allocation8 + $0x28] sm:$0xff]  ;;  %v87_v32 = vld [vmem:[#allocation5 + $0x8] sm:$0xff]  ;;  %v234_v33 = vld [vmem:[#allocation8 + $0x20] sm:$0xff] }
  0x3c   :  { %436 = vmatpush3.msra.mxu0 %v111_v5  ;;  %489 = vmatpush3.msra.mxu1 %v241_v15  ;;  %v94_v34 = vadd.f32 %v87_v32, %v80_v31  ;;  %v233_v35 = vld [vmem:[#allocation8 + $0x18] sm:$0xff]  ;;  %v81_v36 = vld [vmem:[#allocation2 + $0x10] sm:$0xff]  ;;  %v82_v39 = vld [vmem:[#allocation2 + $0x18] sm:$0xff] }
  0x3d   :  { %437 = vmatprep.subr.mxu0 %v656_v0  ;;  %490 = vmatprep.subr.mxu1 %v656_v0  ;;  %v88_v37 = vld [vmem:[#allocation5 + $0x10] sm:$0xff]  ;;  %v89_v40 = vld [vmem:[#allocation5 + $0x18] sm:$0xff]  ;;  %v83_v42 = vld [vmem:[#allocation2 + $0x20] sm:$0xff] }
  0x3e   :  { %438 = vmatpush3.msra.mxu0 %v110_v6  ;;  %491 = vmatpush3.msra.mxu1 %v240_v17  ;;  %v95_v38 = vadd.f32 %v88_v37, %v81_v36  ;;  %v96_v41 = vadd.f32 %v89_v40, %v82_v39  ;;  %v90_v43 = vld [vmem:[#allocation5 + $0x20] sm:$0xff]  ;;  %v84_v45 = vld [vmem:[#allocation2 + $0x28] sm:$0xff]  ;;  %v91_v46 = vld [vmem:[#allocation5 + $0x28] sm:$0xff] }
  0x3f   :  { %439 = vmatprep.subr.mxu0 %v656_v0  ;;  %492 = vmatprep.subr.mxu1 %v656_v0  ;;  %v97_v44 = vadd.f32 %v90_v43, %v83_v42  ;;  %v98_v47 = vadd.f32 %v91_v46, %v84_v45  ;;  %v85_v48 = vld [vmem:[#allocation2 + $0x30] sm:$0xff]  ;;  %v92_v49 = vld [vmem:[#allocation5 + $0x30] sm:$0xff]  ;;  %v232_v51 = vld [vmem:[#allocation8 + $0x10] sm:$0xff] }
  0x40   :  { %440 = vmatpush3.msra.mxu0 %v109_v7  ;;  %493 = vmatpush3.msra.mxu1 %v239_v19  ;;  %v99_v50 = vadd.f32 %v92_v49, %v85_v48  ;;  %v231_v52 = vld [vmem:[#allocation8 + $0x8] sm:$0xff]  ;;  %v230_v53 = vld [vmem:[#allocation8] sm:$0xff]  ;;  %v379_v54 = vld [vmem:[%s793_s3] ss:$0 sm:$0xff] }
  0x41   :  { %441 = vmatprep.subr.mxu0 %v656_v0  ;;  %494 = vmatprep.subr.mxu1 %v656_v0 }
  0x42   :  { %442 = vmatpush3.msra.mxu0 %v108_v10  ;;  %495 = vmatpush3.msra.mxu1 %v238_v21 }
  0x43   :  { %443 = vmatprep.subr.mxu0 %v656_v0  ;;  %496 = vmatprep.subr.mxu1 %v656_v0 }
  0x44   :  { %444 = vmatpush3.msra.mxu0 %v107_v12  ;;  %497 = vmatpush3.msra.mxu1 %v237_v23 }
  0x45   :  { %445 = vmatprep.subr.mxu0 %v656_v0  ;;  %498 = vmatprep.subr.mxu1 %v656_v0 }
  0x46   :  { %446 = vmatpush3.msra.mxu0 %v106_v14  ;;  %499 = vmatpush3.msra.mxu1 %v236_v27 }
  0x47   :  { %447 = vmatprep.subr.mxu0 %v656_v0  ;;  %500 = vmatprep.subr.mxu1 %v656_v0 }
  0x48   :  { %448 = vmatpush3.msra.mxu0 %v105_v16  ;;  %501 = vmatpush3.msra.mxu1 %v235_v30 }
  0x49   :  { %449 = vmatprep.subr.mxu0 %v656_v0  ;;  %502 = vmatprep.subr.mxu1 %v656_v0 }
  0x4a   :  { %450 = vmatpush3.msra.mxu0 %v104_v18  ;;  %503 = vmatpush3.msra.mxu1 %v234_v33 }
  0x4b   :  { %451 = vmatprep.subr.mxu0 %v656_v0  ;;  %504 = vmatprep.subr.mxu1 %v656_v0 }
  0x4c   :  { %452 = vmatpush3.msra.mxu0 %v103_v20  ;;  %505 = vmatpush3.msra.mxu1 %v233_v35  ;;  %v380_v20 = vld [vmem:[%s795_s5] ss:$0 sm:$0xff]  ;;  %s658_s5 = smov [#allocation10]  }
  0x4d   :  { %453 = vmatprep.subr.mxu0 %v656_v0  ;;  %506 = vmatprep.subr.mxu1 %v656_v0  ;;  %s365_s18 = sshll.u32 %s658_s5, 4  ;;  %s366_s18 = int_to_ptr.vmem [resolvable:$true] %s365_s18 }
  0x4e   :  { %454 = vmatpush3.msra.mxu0 %v102_v22  ;;  %507 = vmatpush3.msra.mxu1 %v232_v51  ;;  %s622_s19 = scalar_lea.vmem %s366_s18, 896  ;;  %p627_p7 = scmp.lt.s32.totalorder %s366_s18, %s366_s18 }
  0x4f   :  { %455 = vmatprep.subr.mxu0 %v656_v0  ;;  %508 = vmatprep.subr.mxu1 %v656_v0  ;;  %p623_p6 = scmp.ne.s32.totalorder %s366_s18, %s622_s19  ;;  %p628_p8 = scmp.lt.s32.totalorder %s622_s19, %s622_s19 }
  0x50   :  { %456 = vmatpush3.msra.mxu0 %v101_v26  ;;  %509 = vmatpush3.msra.mxu1 %v231_v52 }
  0x51   :  { %457 = vmatprep.subr.mxu0 %v656_v0  ;;  %510 = vmatprep.subr.mxu1 %v656_v0  ;;  %p629_p9 = por %p628_p8, %p627_p7 }
  0x52   :  { %458 = vmatpush3.msra.mxu0 %v100_v28  ;;  %511 = vmatpush3.msra.mxu1 %v230_v53 }
  0x53   :  { %460 = vmatmul.mubr.f32.vlgmr.msra.gmra.mxu0 %v93_v29  ;;  %p630_p10 = pnand %p629_p9, %p623_p6 }
  0x54   :  { %462 = vmatprep.mubr.msk.f32.mxu0 %vm657_vm0, %v656_v0 }
  0x57   :  { %463 = vmatmul.mubr.f32.gmra.mxu0 %v94_v34 }
  0x58   :  { %465 = vmatprep.mubr.msk.f32.mxu0 %vm657_vm0, %v656_v0 }
  0x5b   :  { %466 = vmatmul.mubr.f32.gmra.mxu0 %v95_v38 }
  0x5c   :  { %468 = vmatprep.mubr.msk.f32.mxu0 %vm657_vm0, %v656_v0 }
  0x5f   :  { %469 = vmatmul.mubr.f32.gmra.mxu0 %v96_v41 }
  0x60   :  { %471 = vmatprep.mubr.msk.f32.mxu0 %vm657_vm0, %v656_v0 }
  0x63   :  { %472 = vmatmul.mubr.f32.gmra.mxu0 %v97_v44 }
  0x64   :  { %474 = vmatprep.mubr.msk.f32.mxu0 %vm657_vm0, %v656_v0 }
  0x67   :  { %475 = vmatmul.mubr.f32.gmra.mxu0 %v98_v47 }
  0x68   :  { %477 = vmatprep.mubr.msk.f32.mxu0 %vm657_vm0, %v656_v0 }
  0x6b   :  { %478 = vmatmul.mubr.f32.gmra.mxu0 %v99_v50 }
 0x113   :  { %v189_v55 = vpop.f32.mrf.mxu0 }
 0x114   :  { %v190_v56 = vadd.f32 %v379_v54, %v189_v55 }
 0x115   :  { %v461_v57 = vpop.f32.mrf.mxu0 }
 0x116   :  { %v223_v58 = vmax.f32 %v190_v56, 0.0 }
 0x117   :  { %v194_v59 = vpop.f32.mrf.mxu0 }
 0x118   :  { %v195_v60 = vadd.f32 %v379_v54, %v194_v59  ;;  %513 = vmatmul.mubr.f32.vlgmr.msra.gmra.mxu1 %v223_v58 }
 0x119   :  { %v464_v61 = vpop.f32.mrf.mxu0  ;;  %515 = vmatprep.mubr.msk.f32.mxu1 %vm657_vm0, %v656_v0 }
 0x11a   :  { %v224_v62 = vmax.f32 %v195_v60, 0.0 }
 0x11b   :  { %v199_v63 = vpop.f32.mrf.mxu0 }
 0x11c   :  { %v200_v1 = vadd.f32 %v379_v54, %v199_v63  ;;  %516 = vmatmul.mubr.f32.gmra.mxu1 %v224_v62 }
 0x11d   :  { %v467_v2 = vpop.f32.mrf.mxu0  ;;  %518 = vmatprep.mubr.msk.f32.mxu1 %vm657_vm0, %v656_v0 }
 0x11e   :  { %v225_v3 = vmax.f32 %v200_v1, 0.0 }
 0x11f   :  { %v204_v4 = vpop.f32.mrf.mxu0 }
 0x120   :  { %v205_v5 = vadd.f32 %v379_v54, %v204_v4  ;;  %519 = vmatmul.mubr.f32.gmra.mxu1 %v225_v3 }
 0x121   :  { %v470_v6 = vpop.f32.mrf.mxu0  ;;  %521 = vmatprep.mubr.msk.f32.mxu1 %vm657_vm0, %v656_v0 }
 0x122   :  { %v226_v7 = vmax.f32 %v205_v5, 0.0 }
 0x123   :  { %v209_v8 = vpop.f32.mrf.mxu0 }
 0x124   :  { %v210_v9 = vadd.f32 %v379_v54, %v209_v8  ;;  %522 = vmatmul.mubr.f32.gmra.mxu1 %v226_v7 }
 0x125   :  { %v473_v10 = vpop.f32.mrf.mxu0  ;;  %524 = vmatprep.mubr.msk.f32.mxu1 %vm657_vm0, %v656_v0 }
 0x126   :  { %v227_v11 = vmax.f32 %v210_v9, 0.0 }
 0x127   :  { %v214_v12 = vpop.f32.mrf.mxu0 }
 0x128   :  { %v215_v13 = vadd.f32 %v379_v54, %v214_v12  ;;  %525 = vmatmul.mubr.f32.gmra.mxu1 %v227_v11 }
 0x129   :  { %v476_v14 = vpop.f32.mrf.mxu0  ;;  %527 = vmatprep.mubr.msk.f32.mxu1 %vm657_vm0, %v656_v0 }
 0x12a   :  { %v228_v15 = vmax.f32 %v215_v13, 0.0 }
 0x12b   :  { %v219_v16 = vpop.f32.mrf.mxu0 }
 0x12c   :  { %v220_v17 = vadd.f32 %v379_v54, %v219_v16  ;;  %528 = vmatmul.mubr.f32.gmra.mxu1 %v228_v15 }
 0x12d   :  { %v479_v18 = vpop.f32.mrf.mxu0  ;;  %530 = vmatprep.mubr.msk.f32.mxu1 %vm657_vm0, %v656_v0 }
 0x12e   :  { %v229_v19 = vmax.f32 %v220_v17, 0.0 }
 0x130   :  { %531 = vmatmul.mubr.f32.gmra.mxu1 %v229_v19 }
 0x1d8   :  { %v319_v21 = vpop.f32.mrf.mxu1 }
 0x1d9   :  { %v320_v22 = vadd.f32 %v380_v20, %v319_v21 }
 0x1da   :  { %v514_v23 = vpop.f32.mrf.mxu1 }
 0x1db   :  { %353 = vst [vmem:[#allocation10] sm:$0xff] %v320_v22 }
 0x1dc   :  { %v324_v24 = vpop.f32.mrf.mxu1 }
 0x1dd   :  { %v325_v25 = vadd.f32 %v380_v20, %v324_v24 }
 0x1de   :  { %v517_v26 = vpop.f32.mrf.mxu1 }
 0x1df   :  { %354 = vst [vmem:[#allocation10 + $0x8] sm:$0xff] %v325_v25 }
 0x1e0   :  { %v329_v27 = vpop.f32.mrf.mxu1 }
 0x1e1   :  { %v330_v28 = vadd.f32 %v380_v20, %v329_v27 }
 0x1e2   :  { %v520_v29 = vpop.f32.mrf.mxu1 }
 0x1e3   :  { %355 = vst [vmem:[#allocation10 + $0x10] sm:$0xff] %v330_v28 }
 0x1e4   :  { %v334_v30 = vpop.f32.mrf.mxu1 }
 0x1e5   :  { %v335_v0 = vadd.f32 %v380_v20, %v334_v30 }
 0x1e6   :  { %v523_v31 = vpop.f32.mrf.mxu1 }
 0x1e7   :  { %356 = vst [vmem:[#allocation10 + $0x18] sm:$0xff] %v335_v0 }
 0x1e8   :  { %v339_v32 = vpop.f32.mrf.mxu1 }
 0x1e9   :  { %v340_v33 = vadd.f32 %v380_v20, %v339_v32 }
 0x1ea   :  { %v526_v34 = vpop.f32.mrf.mxu1 }
 0x1eb   :  { %357 = vst [vmem:[#allocation10 + $0x20] sm:$0xff] %v340_v33 }
 0x1ec   :  { %v344_v35 = vpop.f32.mrf.mxu1 }
 0x1ed   :  { %v345_v36 = vadd.f32 %v380_v20, %v344_v35 }
 0x1ee   :  { %v529_v37 = vpop.f32.mrf.mxu1 }
 0x1ef   :  { %358 = vst [vmem:[#allocation10 + $0x28] sm:$0xff] %v345_v36 }
 0x1f0   :  { %v349_v38 = vpop.f32.mrf.mxu1 }
 0x1f1   :  { %v350_v39 = vadd.f32 %v380_v20, %v349_v38 }
 0x1f2   :  { %v532_v40 = vpop.f32.mrf.mxu1 }
 0x1f3   :  { %359 = vst [vmem:[#allocation10 + $0x30] sm:$0xff] %v350_v39 }
 0x1f4   :  { %633 = shalt.err (!%p630_p10)
}
 0x1f5   :  { %371 = dma.vmem_to_hbm [thread:$0]  %s366_s18, 896, %s796_s6, [#allocation4], %s652_s26, %s652_s26, %s653_s27  }
 0x1f6   :  { %648 = dma.done.wait [#allocation4], 896  }
 0x1f7   :  { %649 = vsyncadd [#allocation4], 4294966400 }
 0x1f8   :  { %375 = vsyncpa [#allocation3], 1 }
 0x1f9   :  { %376 = vsyncpa [#allocation6], 1 }
 0x1fa   :  { %377 = vsyncpa [#allocation9], 1 }
 0x1fb   :  { %378 = vsyncpa [#allocation4], 1 }

</bundles_post_ra>
